<compile_context>
chip_gen: v5e
topology: v5e:2x2
jax: 0.10.0
libtpu: 0.0.40
codegen_flags: <defaults>
</compile_context>

<pallas_src>
import jax
import jax.numpy as jnp
from jax.experimental import pallas as pl
from jax.experimental.pallas import tpu as pltpu


def mlp_kernel(x_ref, w1_ref, b1_ref, w2_ref, b2_ref, w3_ref, b3_ref, o_ref):
    # Whole per-tile forward pass fused in VMEM:
    #   MXU matmuls (f32 accumulation) + f32 bias/ReLU on the VPU.
    x = x_ref[...]
    h1 = jnp.dot(x, w1_ref[...], preferred_element_type=jnp.float32) + b1_ref[...]
    h1 = jnp.maximum(h1, 0.0)
    h2 = jnp.dot(h1.astype(w2_ref.dtype), w2_ref[...],
                 preferred_element_type=jnp.float32) + b2_ref[...]
    h2 = jnp.maximum(h2, 0.0)
    out = jnp.dot(h2.astype(w3_ref.dtype), w3_ref[...],
                  preferred_element_type=jnp.float32) + b3_ref[...]
    o_ref[...] = out.astype(o_ref.dtype)


def _round_up(n, m):
    return ((n + m - 1) // m) * m


def _block_diag(w, p):
    """[fi, fo] -> [p*fi, p*fo] block-diagonal with p copies of w (tiny, built once)."""
    fi, fo = w.shape
    out = jnp.zeros((p * fi, p * fo), w.dtype)
    for i in range(p):
        out = out.at[i * fi:(i + 1) * fi, i * fo:(i + 1) * fo].set(w)
    return out


def neural_network_forward(x, params, *, compute_dtype=None, pack=8, tb_max=8192):
    """Runs the batch-folded, batch-tiled fused MLP Pallas kernel.

    x:      [B, num_inputs] float32
    params: dict with w1 [num_inputs,30], b1 [1,30], w2 [30,20], b2 [1,20],
            w3 [20,num_outputs], b3 [1,num_outputs]  (weights stored as [in,out])
    compute_dtype: dtype used to stream x / weights through the MXU
            (jnp.bfloat16 halves the dominant HBM read traffic on v6e/v7x).
            Matmuls always accumulate in f32; bias/ReLU stay f32.
            Default None = x.dtype (exact f32 parity with the PyTorch module).
    pack:   rows folded per packed row (block-diagonal weight factor).
            8 suits v6e/v7x (256-deep MXU); 4 is the sweet spot on v5e.
    tb_max: cap on the batch-tile size in ORIGINAL rows.
    """
    B, num_inputs = x.shape
    num_outputs = params["w3"].shape[1]
    out_dtype = x.dtype
    if compute_dtype is None:
        compute_dtype = x.dtype  # exact f32 semantics of the nn.Module

    # Row alignment: `pack` rows per packed row x 16 sublanes per packed tile
    # (16 covers bf16 sublane packing as well as f32).
    align = pack * 16
    if B <= align:
        TB = align
    else:
        # Large batch: biggest aligned tile <= tb_max, but keep >= 2 grid steps
        # so the parallel batch axis can shard across v7x's two TensorCores.
        half = -(-B // 2)
        TB = max(align, min(_round_up(tb_max, align), _round_up(half, align)))
    B_pad = _round_up(B, TB)
    if B_pad != B:
        x = jnp.pad(x, ((0, B_pad - B), (0, 0)))
    x = x.astype(compute_dtype)

    # Batch fold: (B_pad, ni) -> (B_pad/pack, pack*ni). Row-major => free reshape.
    TBP = TB // pack
    xp = x.reshape(B_pad // pack, pack * num_inputs)

    # Block-diagonal weights / tiled biases (tiny; constant index_map => pinned
    # in VMEM for the whole grid).
    w1 = _block_diag(params["w1"].astype(compute_dtype), pack)
    w2 = _block_diag(params["w2"].astype(compute_dtype), pack)
    w3 = _block_diag(params["w3"].astype(compute_dtype), pack)
    b1 = jnp.tile(params["b1"].astype(jnp.float32), (1, pack))
    b2 = jnp.tile(params["b2"].astype(jnp.float32), (1, pack))
    b3 = jnp.tile(params["b3"].astype(jnp.float32), (1, pack))

    grid = (B_pad // TB,)

    def const(shape):
        return pl.BlockSpec(shape, lambda i: (0,) * len(shape))

    outp = pl.pallas_call(
        mlp_kernel,
        out_shape=jax.ShapeDtypeStruct(
            (B_pad // pack, pack * num_outputs), out_dtype),
        grid=grid,
        in_specs=[
            pl.BlockSpec((TBP, pack * num_inputs), lambda i: (i, 0)),
            const(w1.shape), const(b1.shape),
            const(w2.shape), const(b2.shape),
            const(w3.shape), const(b3.shape),
        ],
        out_specs=pl.BlockSpec((TBP, pack * num_outputs), lambda i: (i, 0)),
        compiler_params=pltpu.CompilerParams(
            dimension_semantics=("parallel",)),
    )(xp, w1, b1, w2, b2, w3, b3)

    # Unfold (free reshape) and drop padding rows.
    return outp.reshape(B_pad, num_outputs)[:B]


def init_params(key, num_inputs, num_outputs):
    """Deterministic init mimicking torch.nn.Linear default (uniform +/- 1/sqrt(fan_in))."""
    dims = [(num_inputs, 30), (30, 20), (20, num_outputs)]
    params = {}
    for i, (fan_in, fan_out) in enumerate(dims, start=1):
        key, kw, kb = jax.random.split(key, 3)
        bound = 1.0 / jnp.sqrt(fan_in)
        # Stored as [in, out] (i.e. the transpose of PyTorch's [out, in] weight).
        params[f"w{i}"] = jax.random.uniform(
            kw, (fan_in, fan_out), jnp.float32, -bound, bound)
        params[f"b{i}"] = jax.random.uniform(
            kb, (1, fan_out), jnp.float32, -bound, bound)
    return params


def reference_forward(x, params):
    h1 = jnp.maximum(x @ params["w1"] + params["b1"], 0.0)
    h2 = jnp.maximum(h1 @ params["w2"] + params["b2"], 0.0)
    return h2 @ params["w3"] + params["b3"]


if __name__ == "__main__":
    num_inputs, num_outputs = 32, 8
    batch = 8

    key = jax.random.PRNGKey(0)
    key, kx = jax.random.split(key)
    x = jax.random.normal(kx, (batch, num_inputs), jnp.float32)
    params = init_params(key, num_inputs, num_outputs)

    # Single-tile path (batch=8 -> padded to one packed tile), exact f32 path.
    out = jax.block_until_ready(neural_network_forward(x, params))
    ref = reference_forward(x, params)
    assert out.shape == (batch, num_outputs)
    assert jnp.allclose(out, ref, atol=1e-5, rtol=1e-5)

    # Multi-tile path: small tile cap so the batch grid has several steps and a
    # padded ragged tail, exercising the pipelined / parallel-axis path.
    key, kx2 = jax.random.split(key)
    x2 = jax.random.normal(kx2, (300, num_inputs), jnp.float32)
    out2 = jax.block_until_ready(
        neural_network_forward(x2, params, tb_max=128))
    ref2 = reference_forward(x2, params)
    assert out2.shape == (300, num_outputs)
    assert jnp.allclose(out2, ref2, atol=1e-5, rtol=1e-5)

    # Optional bf16 streaming path (halves HBM read traffic; f32 accumulation).
    out_bf16 = jax.block_until_ready(
        neural_network_forward(x2, params, compute_dtype=jnp.bfloat16))
    assert out_bf16.shape == (300, num_outputs)
    assert jnp.allclose(out_bf16, ref2, atol=1e-1, rtol=1e-1)

    print("KERNEL_OK")
</pallas_src>

<mosaic_0001>
module attributes {stable_mosaic.version = 11 : i64} {
  func.func @mlp_kernel(%arg0: i32, %arg1: memref<16x256xf32, #tpu.memory_space<vmem>>, %arg2: memref<256x240xf32, #tpu.memory_space<vmem>>, %arg3: memref<1x240xf32, #tpu.memory_space<vmem>>, %arg4: memref<240x160xf32, #tpu.memory_space<vmem>>, %arg5: memref<1x160xf32, #tpu.memory_space<vmem>>, %arg6: memref<160x64xf32, #tpu.memory_space<vmem>>, %arg7: memref<1x64xf32, #tpu.memory_space<vmem>>, %arg8: memref<16x64xf32, #tpu.memory_space<vmem>>) attributes {dimension_semantics = [#tpu.dimension_semantics<parallel>], iteration_bounds = array<i64: 1>, scalar_prefetch = 0 : i64, scratch_operands = 0 : i64, tpu.core_type = #tpu.core_type<tc>, window_params = [{transform_indices = @transform_0, window_bounds = array<i64: 16, 256>}, {pipeline_mode = #tpu.pipeline_mode<synchronous>, transform_indices = @transform_1, window_bounds = array<i64: 256, 240>}, {pipeline_mode = #tpu.pipeline_mode<synchronous>, transform_indices = @transform_2, window_bounds = array<i64: 1, 240>}, {pipeline_mode = #tpu.pipeline_mode<synchronous>, transform_indices = @transform_3, window_bounds = array<i64: 240, 160>}, {pipeline_mode = #tpu.pipeline_mode<synchronous>, transform_indices = @transform_4, window_bounds = array<i64: 1, 160>}, {pipeline_mode = #tpu.pipeline_mode<synchronous>, transform_indices = @transform_5, window_bounds = array<i64: 160, 64>}, {pipeline_mode = #tpu.pipeline_mode<synchronous>, transform_indices = @transform_6, window_bounds = array<i64: 1, 64>}, {transform_indices = @transform_7, window_bounds = array<i64: 16, 64>}]} {
    %c0 = arith.constant 0 : index
    %c0_0 = arith.constant 0 : index
    %0 = vector.load %arg1[%c0, %c0_0] : memref<16x256xf32, #tpu.memory_space<vmem>>, vector<16x256xf32>
    %c0_1 = arith.constant 0 : index
    %c0_2 = arith.constant 0 : index
    %1 = vector.load %arg2[%c0_1, %c0_2] : memref<256x240xf32, #tpu.memory_space<vmem>>, vector<256x240xf32>
    %cst = arith.constant dense<0.000000e+00> : vector<16x240xf32>
    %2 = tpu.matmul %0, %1, %cst {dimension_numbers = #tpu.dot_dimension_numbers<[1], [0], [0], [1], [0, 0, 1, 1], [], []>} : vector<16x256xf32>, vector<256x240xf32>, vector<16x240xf32> -> vector<16x240xf32>
    %c0_3 = arith.constant 0 : index
    %c0_4 = arith.constant 0 : index
    %3 = vector.load %arg3[%c0_3, %c0_4] : memref<1x240xf32, #tpu.memory_space<vmem>>, vector<1x240xf32>
    %4 = vector.broadcast %3 : vector<1x240xf32> to vector<16x240xf32>
    %5 = arith.addf %2, %4 : vector<16x240xf32>
    %cst_5 = arith.constant 0.000000e+00 : f32
    %6 = vector.broadcast %cst_5 : f32 to vector<16x240xf32>
    %7 = arith.maximumf %5, %6 : vector<16x240xf32>
    %c0_6 = arith.constant 0 : index
    %c0_7 = arith.constant 0 : index
    %8 = vector.load %arg4[%c0_6, %c0_7] : memref<240x160xf32, #tpu.memory_space<vmem>>, vector<240x160xf32>
    %cst_8 = arith.constant dense<0.000000e+00> : vector<16x160xf32>
    %9 = tpu.matmul %7, %8, %cst_8 {dimension_numbers = #tpu.dot_dimension_numbers<[1], [0], [0], [1], [0, 0, 1, 1], [], []>} : vector<16x240xf32>, vector<240x160xf32>, vector<16x160xf32> -> vector<16x160xf32>
    %c0_9 = arith.constant 0 : index
    %c0_10 = arith.constant 0 : index
    %10 = vector.load %arg5[%c0_9, %c0_10] : memref<1x160xf32, #tpu.memory_space<vmem>>, vector<1x160xf32>
    %11 = vector.broadcast %10 : vector<1x160xf32> to vector<16x160xf32>
    %12 = arith.addf %9, %11 : vector<16x160xf32>
    %cst_11 = arith.constant 0.000000e+00 : f32
    %13 = vector.broadcast %cst_11 : f32 to vector<16x160xf32>
    %14 = arith.maximumf %12, %13 : vector<16x160xf32>
    %c0_12 = arith.constant 0 : index
    %c0_13 = arith.constant 0 : index
    %15 = vector.load %arg6[%c0_12, %c0_13] : memref<160x64xf32, #tpu.memory_space<vmem>>, vector<160x64xf32>
    %cst_14 = arith.constant dense<0.000000e+00> : vector<16x64xf32>
    %16 = tpu.matmul %14, %15, %cst_14 {dimension_numbers = #tpu.dot_dimension_numbers<[1], [0], [0], [1], [0, 0, 1, 1], [], []>} : vector<16x160xf32>, vector<160x64xf32>, vector<16x64xf32> -> vector<16x64xf32>
    %c0_15 = arith.constant 0 : index
    %c0_16 = arith.constant 0 : index
    %17 = vector.load %arg7[%c0_15, %c0_16] : memref<1x64xf32, #tpu.memory_space<vmem>>, vector<1x64xf32>
    %18 = vector.broadcast %17 : vector<1x64xf32> to vector<16x64xf32>
    %19 = arith.addf %16, %18 : vector<16x64xf32>
    %c0_17 = arith.constant 0 : index
    %c0_18 = arith.constant 0 : index
    %20 = vector.load %arg8[%c0_17, %c0_18] : memref<16x64xf32, #tpu.memory_space<vmem>>, vector<16x64xf32>
    tpu.vector_store %arg8[%c0_17, %c0_18], %19 {strides = array<i32>} : memref<16x64xf32, #tpu.memory_space<vmem>>, vector<16x64xf32>,
    return
  }
  func.func @transform_0(%arg0: i32) -> (i32, i32) {
    %c0_i32 = arith.constant 0 : i32
    %c0_i32_0 = arith.constant 0 : i32
    return %arg0, %c0_i32 : i32, i32
  }
  func.func @transform_1(%arg0: i32) -> (i32, i32) {
    %c0_i32 = arith.constant 0 : i32
    %c0_i32_0 = arith.constant 0 : i32
    %c0_i32_1 = arith.constant 0 : i32
    return %c0_i32, %c0_i32_0 : i32, i32
  }
  func.func @transform_2(%arg0: i32) -> (i32, i32) {
    %c0_i32 = arith.constant 0 : i32
    %c0_i32_0 = arith.constant 0 : i32
    %c0_i32_1 = arith.constant 0 : i32
    return %c0_i32, %c0_i32_0 : i32, i32
  }
  func.func @transform_3(%arg0: i32) -> (i32, i32) {
    %c0_i32 = arith.constant 0 : i32
    %c0_i32_0 = arith.constant 0 : i32
    %c0_i32_1 = arith.constant 0 : i32
    return %c0_i32, %c0_i32_0 : i32, i32
  }
  func.func @transform_4(%arg0: i32) -> (i32, i32) {
    %c0_i32 = arith.constant 0 : i32
    %c0_i32_0 = arith.constant 0 : i32
    %c0_i32_1 = arith.constant 0 : i32
    return %c0_i32, %c0_i32_0 : i32, i32
  }
  func.func @transform_5(%arg0: i32) -> (i32, i32) {
    %c0_i32 = arith.constant 0 : i32
    %c0_i32_0 = arith.constant 0 : i32
    %c0_i32_1 = arith.constant 0 : i32
    return %c0_i32, %c0_i32_0 : i32, i32
  }
  func.func @transform_6(%arg0: i32) -> (i32, i32) {
    %c0_i32 = arith.constant 0 : i32
    %c0_i32_0 = arith.constant 0 : i32
    %c0_i32_1 = arith.constant 0 : i32
    return %c0_i32, %c0_i32_0 : i32, i32
  }
  func.func @transform_7(%arg0: i32) -> (i32, i32) {
    %c0_i32 = arith.constant 0 : i32
    %c0_i32_0 = arith.constant 0 : i32
    return %arg0, %c0_i32 : i32, i32
  }
}

</mosaic_0001>

<bundles_post_ra>
// kernel: tpu_custom_call.1
= control target key start
LH: loop header
LB: loop body
LE: loop exit
PB: predicated region body
PF: predicated region fallthrough
CT: control target
= control target key end

     0   :  { %s1019_s0 = inlined_call_operand.vmem [shape: f32[16,256], index: 0, kind: input, shape index: {}]   ;;  %s1020_s1 = inlined_call_operand.vmem [shape: f32[256,240], index: 1, kind: input, shape index: {}]   ;;  %s1021_s2 = inlined_call_operand.vmem [shape: f32[1,240], index: 2, kind: input, shape index: {}]   ;;  %s1022_s3 = inlined_call_operand.vmem [shape: f32[240,160], index: 3, kind: input, shape index: {}]   ;;  %s1023_s4 = inlined_call_operand.vmem [shape: f32[1,160], index: 4, kind: input, shape index: {}]   ;;  %s1024_s5 = inlined_call_operand.vmem [shape: f32[160,64], index: 5, kind: input, shape index: {}]   ;;  %s1025_s6 = inlined_call_operand.vmem [shape: f32[1,64], index: 6, kind: input, shape index: {}]   ;;  %s1026_s7 = inlined_call_operand.hbm [shape: f32[16,64], index: 7, kind: output, shape index: {}]  }
   0x1   :  { %v62_v0 = vld [vmem:[%s1020_s1 + $0xf8] sm:$0xff]  ;;  %v60_v1 = vld [vmem:[%s1020_s1 + $0xe8] sm:$0xff]  ;;  %v61_v3 = vld [vmem:[%s1020_s1 + $0xf0] sm:$0xff] }
   0x2   :  { %v94_v2 = vld [vmem:[%s1020_s1 + $0x1f8] sm:$0xff]  ;;  %147 = vmatpush.msra.mxu2 %v62_v0  ;;  %v92_v4 = vld [vmem:[%s1020_s1 + $0x1e8] sm:$0xff]  ;;  %101 = vmatpush.msra.mxu0 %v61_v3  ;;  %v59_v6 = vld [vmem:[%s1020_s1 + $0xe0] sm:$0xff] }
   0x3   :  { %170 = vmatpush.msra.mxu3 %v94_v2  ;;  %v58_v5 = vld [vmem:[%s1020_s1 + $0xd8] sm:$0xff]  ;;  %v93_v7 = vld [vmem:[%s1020_s1 + $0x1f0] sm:$0xff]  ;;  %v91_v10 = vld [vmem:[%s1020_s1 + $0x1e0] sm:$0xff] }
   0x4   :  { %148 = vmatpush.msra.mxu2 %v60_v1  ;;  %v90_v8 = vld [vmem:[%s1020_s1 + $0x1d8] sm:$0xff]  ;;  %v57_v9 = vld [vmem:[%s1020_s1 + $0xd0] sm:$0xff]  ;;  %102 = vmatpush.msra.mxu0 %v59_v6  ;;  %v56_v11 = vld [vmem:[%s1020_s1 + $0xc8] sm:$0xff] }
   0x5   :  { %171 = vmatpush.msra.mxu3 %v92_v4  ;;  %124 = vmatpush.msra.mxu1 %v93_v7  ;;  %v88_v12 = vld [vmem:[%s1020_s1 + $0x1c8] sm:$0xff]  ;;  %v55_v13 = vld [vmem:[%s1020_s1 + $0xc0] sm:$0xff]  ;;  %v89_v14 = vld [vmem:[%s1020_s1 + $0x1d0] sm:$0xff] }
   0x6   :  { %149 = vmatpush.msra.mxu2 %v58_v5  ;;  %103 = vmatpush.msra.mxu0 %v57_v9  ;;  %v54_v15 = vld [vmem:[%s1020_s1 + $0xb8] sm:$0xff]  ;;  %v53_v17 = vld [vmem:[%s1020_s1 + $0xb0] sm:$0xff]  ;;  %v87_v18 = vld [vmem:[%s1020_s1 + $0x1c0] sm:$0xff] }
   0x7   :  { %172 = vmatpush.msra.mxu3 %v90_v8  ;;  %125 = vmatpush.msra.mxu1 %v91_v10  ;;  %v86_v16 = vld [vmem:[%s1020_s1 + $0x1b8] sm:$0xff]  ;;  %v52_v19 = vld [vmem:[%s1020_s1 + $0xa8] sm:$0xff]  ;;  %v51_v21 = vld [vmem:[%s1020_s1 + $0xa0] sm:$0xff] }
   0x8   :  { %150 = vmatpush.msra.mxu2 %v56_v11  ;;  %104 = vmatpush.msra.mxu0 %v55_v13  ;;  %v84_v20 = vld [vmem:[%s1020_s1 + $0x1a8] sm:$0xff]  ;;  %v85_v22 = vld [vmem:[%s1020_s1 + $0x1b0] sm:$0xff]  ;;  %v50_v23 = vld [vmem:[%s1020_s1 + $0x98] sm:$0xff] }
   0x9   :  { %173 = vmatpush.msra.mxu3 %v88_v12  ;;  %126 = vmatpush.msra.mxu1 %v89_v14  ;;  %v82_v24 = vld [vmem:[%s1020_s1 + $0x198] sm:$0xff]  ;;  %v49_v25 = vld [vmem:[%s1020_s1 + $0x90] sm:$0xff]  ;;  %v83_v26 = vld [vmem:[%s1020_s1 + $0x1a0] sm:$0xff] }
   0xa   :  { %151 = vmatpush.msra.mxu2 %v54_v15  ;;  %105 = vmatpush.msra.mxu0 %v53_v17  ;;  %v48_v27 = vld [vmem:[%s1020_s1 + $0x88] sm:$0xff]  ;;  %v47_v29 = vld [vmem:[%s1020_s1 + $0x80] sm:$0xff]  ;;  %v81_v30 = vld [vmem:[%s1020_s1 + $0x190] sm:$0xff] }
   0xb   :  { %174 = vmatpush.msra.mxu3 %v86_v16  ;;  %127 = vmatpush.msra.mxu1 %v87_v18  ;;  %v80_v28 = vld [vmem:[%s1020_s1 + $0x188] sm:$0xff]  ;;  %v46_v31 = vld [vmem:[%s1020_s1 + $0x78] sm:$0xff]  ;;  %v45_v33 = vld [vmem:[%s1020_s1 + $0x70] sm:$0xff] }
   0xc   :  { %152 = vmatpush.msra.mxu2 %v52_v19  ;;  %106 = vmatpush.msra.mxu0 %v51_v21  ;;  %v78_v32 = vld [vmem:[%s1020_s1 + $0x178] sm:$0xff]  ;;  %v79_v34 = vld [vmem:[%s1020_s1 + $0x180] sm:$0xff]  ;;  %v44_v35 = vld [vmem:[%s1020_s1 + $0x68] sm:$0xff] }
   0xd   :  { %175 = vmatpush.msra.mxu3 %v84_v20  ;;  %128 = vmatpush.msra.mxu1 %v85_v22  ;;  %v76_v36 = vld [vmem:[%s1020_s1 + $0x168] sm:$0xff]  ;;  %v43_v37 = vld [vmem:[%s1020_s1 + $0x60] sm:$0xff]  ;;  %v77_v38 = vld [vmem:[%s1020_s1 + $0x170] sm:$0xff] }
   0xe   :  { %153 = vmatpush.msra.mxu2 %v50_v23  ;;  %107 = vmatpush.msra.mxu0 %v49_v25  ;;  %v42_v39 = vld [vmem:[%s1020_s1 + $0x58] sm:$0xff]  ;;  %v41_v41 = vld [vmem:[%s1020_s1 + $0x50] sm:$0xff]  ;;  %v75_v42 = vld [vmem:[%s1020_s1 + $0x160] sm:$0xff] }
   0xf   :  { %176 = vmatpush.msra.mxu3 %v82_v24  ;;  %129 = vmatpush.msra.mxu1 %v83_v26  ;;  %v74_v40 = vld [vmem:[%s1020_s1 + $0x158] sm:$0xff]  ;;  %v40_v43 = vld [vmem:[%s1020_s1 + $0x48] sm:$0xff]  ;;  %v39_v45 = vld [vmem:[%s1020_s1 + $0x40] sm:$0xff] }
  0x10   :  { %154 = vmatpush.msra.mxu2 %v48_v27  ;;  %108 = vmatpush.msra.mxu0 %v47_v29  ;;  %v72_v44 = vld [vmem:[%s1020_s1 + $0x148] sm:$0xff]  ;;  %v73_v46 = vld [vmem:[%s1020_s1 + $0x150] sm:$0xff]  ;;  %v38_v47 = vld [vmem:[%s1020_s1 + $0x38] sm:$0xff] }
  0x11   :  { %177 = vmatpush.msra.mxu3 %v80_v28  ;;  %130 = vmatpush.msra.mxu1 %v81_v30  ;;  %v70_v48 = vld [vmem:[%s1020_s1 + $0x138] sm:$0xff]  ;;  %v37_v49 = vld [vmem:[%s1020_s1 + $0x30] sm:$0xff]  ;;  %v71_v50 = vld [vmem:[%s1020_s1 + $0x140] sm:$0xff] }
  0x12   :  { %155 = vmatpush.msra.mxu2 %v46_v31  ;;  %109 = vmatpush.msra.mxu0 %v45_v33  ;;  %v36_v51 = vld [vmem:[%s1020_s1 + $0x28] sm:$0xff]  ;;  %v35_v53 = vld [vmem:[%s1020_s1 + $0x20] sm:$0xff]  ;;  %v69_v54 = vld [vmem:[%s1020_s1 + $0x130] sm:$0xff] }
  0x13   :  { %178 = vmatpush.msra.mxu3 %v78_v32  ;;  %131 = vmatpush.msra.mxu1 %v79_v34  ;;  %v68_v52 = vld [vmem:[%s1020_s1 + $0x128] sm:$0xff]  ;;  %v34_v55 = vld [vmem:[%s1020_s1 + $0x18] sm:$0xff]  ;;  %v33_v57 = vld [vmem:[%s1020_s1 + $0x10] sm:$0xff] }
  0x14   :  { %156 = vmatpush.msra.mxu2 %v44_v35  ;;  %110 = vmatpush.msra.mxu0 %v43_v37  ;;  %v66_v56 = vld [vmem:[%s1020_s1 + $0x118] sm:$0xff]  ;;  %v67_v58 = vld [vmem:[%s1020_s1 + $0x120] sm:$0xff]  ;;  %v32_v59 = vld [vmem:[%s1020_s1 + $0x8] sm:$0xff] }
  0x15   :  { %179 = vmatpush.msra.mxu3 %v76_v36  ;;  %132 = vmatpush.msra.mxu1 %v77_v38  ;;  %v64_v60 = vld [vmem:[%s1020_s1 + $0x108] sm:$0xff]  ;;  %v27_v61 = vld [vmem:[%s1019_s0] sm:$0xff]  ;;  %v65_v0 = vld [vmem:[%s1020_s1 + $0x110] sm:$0xff] }
  0x16   :  { %157 = vmatpush.msra.mxu2 %v42_v39  ;;  %111 = vmatpush.msra.mxu0 %v41_v41  ;;  %v28_v62 = vld [vmem:[%s1019_s0 + $0x8] sm:$0xff]  ;;  %v31_v63 = vld [vmem:[%s1020_s1] sm:$0xff]  ;;  %v228_v1 = vld [vmem:[%s1022_s3 + $0xf8] sm:$0xff] }
  0x17   :  { %180 = vmatpush.msra.mxu3 %v74_v40  ;;  %133 = vmatpush.msra.mxu1 %v75_v42  ;;  %v63_v2 = vld [vmem:[%s1020_s1 + $0x100] sm:$0xff]  ;;  %v227_v3 = vld [vmem:[%s1022_s3 + $0xf0] sm:$0xff]  ;;  %v226_v4 = vld [vmem:[%s1022_s3 + $0xe8] sm:$0xff] }
  0x18   :  { %158 = vmatpush.msra.mxu2 %v40_v43  ;;  %112 = vmatpush.msra.mxu0 %v39_v45  ;;  %v225_v5 = vld [vmem:[%s1022_s3 + $0xe0] sm:$0xff]  ;;  %v255_v6 = vld [vmem:[%s1022_s3 + $0x1d0] sm:$0xff]  ;;  %v224_v7 = vld [vmem:[%s1022_s3 + $0xd8] sm:$0xff] }
  0x19   :  { %181 = vmatpush.msra.mxu3 %v72_v44  ;;  %134 = vmatpush.msra.mxu1 %v73_v46  ;;  %v256_v8 = vld [vmem:[%s1022_s3 + $0x1d8] sm:$0xff]  ;;  %v29_v9 = vld [vmem:[%s1019_s0 + $0x10] sm:$0xff]  ;;  %v253_v11 = vld [vmem:[%s1022_s3 + $0x1c0] sm:$0xff] }
  0x1a   :  { %159 = vmatpush.msra.mxu2 %v38_v47  ;;  %113 = vmatpush.msra.mxu0 %v37_v49  ;;  %v223_v10 = vld [vmem:[%s1022_s3 + $0xd0] sm:$0xff]  ;;  %v30_v12 = vld [vmem:[%s1019_s0 + $0x18] sm:$0xff] }
  0x1b   :  { %182 = vmatpush.msra.mxu3 %v70_v48  ;;  %135 = vmatpush.msra.mxu1 %v71_v50 }
  0x1c   :  { %160 = vmatpush.msra.mxu2 %v36_v51  ;;  %114 = vmatpush.msra.mxu0 %v35_v53 }
  0x1d   :  { %183 = vmatpush.msra.mxu3 %v68_v52  ;;  %136 = vmatpush.msra.mxu1 %v69_v54 }
  0x1e   :  { %161 = vmatpush.msra.mxu2 %v34_v55  ;;  %115 = vmatpush.msra.mxu0 %v33_v57 }
  0x1f   :  { %184 = vmatpush.msra.mxu3 %v66_v56  ;;  %137 = vmatpush.msra.mxu1 %v67_v58 }
  0x20   :  { %162 = vmatpush.msra.mxu2 %v32_v59  ;;  %116 = vmatpush.msra.mxu0 %v31_v63 }
  0x21   :  { %185 = vmatpush.msra.mxu3 %v64_v60  ;;  %163 = vmatmul.f32.vlgmr.msra.gmra.mxu2 %v27_v61 }
  0x22   :  { %186 = vmatmul.f32.vlgmr.msra.gmra.mxu3 %v28_v62  ;;  %138 = vmatpush.msra.mxu1 %v65_v0 }
  0x23   :  { %117 = vmatmul.f32.vlgmr.msra.gmra.mxu0 %v27_v61  ;;  %316 = vmatpush.msrb.mxu2 %v228_v1 }
  0x24   :  { %139 = vmatpush.msra.mxu1 %v63_v2  ;;  %270 = vmatpush.msrb.mxu0 %v227_v3 }
  0x25   :  { %140 = vmatmul.f32.vlgmr.msra.gmra.mxu1 %v28_v62  ;;  %317 = vmatpush.msrb.mxu2 %v226_v4 }
  0x26   :  { %271 = vmatpush.msrb.mxu0 %v225_v5  ;;  %295 = vmatpush.msrb.mxu1 %v255_v6 }
  0x27   :  { %12 = vsyncpa [#allocation3], 0  ;;  %318 = vmatpush.msrb.mxu2 %v224_v7  ;;  %v221_v13 = vld [vmem:[%s1022_s3 + $0xc0] sm:$0xff]  ;;  %v222_v14 = vld [vmem:[%s1022_s3 + $0xc8] sm:$0xff]  ;;  %341 = vmatpush.msrb.mxu3 %v256_v8  ;;  %vm263_vm0 = vcmask 916480   ;;  %vm390_vm1 = vcmask 261120  }
  0x28   :  { %272 = vmatpush.msrb.mxu0 %v223_v10  ;;  %296 = vmatpush.msrb.mxu1 %v253_v11  ;;  %v254_v15 = vld [vmem:[%s1022_s3 + $0x1c8] sm:$0xff]  ;;  %v219_v16 = vld [vmem:[%s1022_s3 + $0xb0] sm:$0xff]  ;;  %v220_v17 = vld [vmem:[%s1022_s3 + $0xb8] sm:$0xff]  ;;  %vm443_vm2 = vcmask 523264   ;;  %s516_s9 = smov [#allocation2]   ;;  %s452_s12 = sshll.u32 %s1026_s7, 4  ;;  %s453_s12 = int_to_ptr.hbm [resolvable:$true] %s452_s12 }
  0x29   :  { %166 = vmatmul.f32.gmra.mxu2 %v29_v9  ;;  %v252_v18 = vld [vmem:[%s1022_s3 + $0x1b8] sm:$0xff]  ;;  %342 = vmatpush.msrb.mxu3 %v254_v15  ;;  %v217_v19 = vld [vmem:[%s1022_s3 + $0xa0] sm:$0xff]  ;;  %v251_v20 = vld [vmem:[%s1022_s3 + $0x1b0] sm:$0xff]  ;;  %s450_s10 = sshll.u32 %s516_s9, 4  ;;  %s518_s13 = smov 8   ;;  %s451_s10 = int_to_ptr.vmem [resolvable:$true] %s450_s10 }
  0x2a   :  { %189 = vmatmul.f32.gmra.mxu3 %v30_v12  ;;  %273 = vmatpush.msrb.mxu0 %v221_v13  ;;  %v218_v21 = vld [vmem:[%s1022_s3 + $0xa8] sm:$0xff]  ;;  %v215_v23 = vld [vmem:[%s1022_s3 + $0x90] sm:$0xff]  ;;  %v249_v24 = vld [vmem:[%s1022_s3 + $0x1a0] sm:$0xff] }
  0x2b   :  { %319 = vmatpush.msrb.mxu2 %v222_v14  ;;  %120 = vmatmul.f32.gmra.mxu0 %v29_v9  ;;  %v250_v22 = vld [vmem:[%s1022_s3 + $0x1a8] sm:$0xff]  ;;  %v216_v25 = vld [vmem:[%s1022_s3 + $0x98] sm:$0xff]  ;;  %v213_v27 = vld [vmem:[%s1022_s3 + $0x80] sm:$0xff] }
  0x2c   :  { %274 = vmatpush.msrb.mxu0 %v219_v16  ;;  %343 = vmatpush.msrb.mxu3 %v252_v18  ;;  %v248_v26 = vld [vmem:[%s1022_s3 + $0x198] sm:$0xff]  ;;  %v247_v28 = vld [vmem:[%s1022_s3 + $0x190] sm:$0xff]  ;;  %v214_v29 = vld [vmem:[%s1022_s3 + $0x88] sm:$0xff] }
  0x2d   :  { %320 = vmatpush.msrb.mxu2 %v220_v17  ;;  %143 = vmatmul.f32.gmra.mxu1 %v30_v12  ;;  %v246_v30 = vld [vmem:[%s1022_s3 + $0x188] sm:$0xff]  ;;  %v211_v31 = vld [vmem:[%s1022_s3 + $0x70] sm:$0xff]  ;;  %v245_v32 = vld [vmem:[%s1022_s3 + $0x180] sm:$0xff] }
  0x2e   :  { %275 = vmatpush.msrb.mxu0 %v217_v19  ;;  %297 = vmatpush.msrb.mxu1 %v251_v20  ;;  %v212_v33 = vld [vmem:[%s1022_s3 + $0x78] sm:$0xff]  ;;  %v209_v35 = vld [vmem:[%s1022_s3 + $0x60] sm:$0xff]  ;;  %v243_v36 = vld [vmem:[%s1022_s3 + $0x170] sm:$0xff] }
  0x2f   :  { %321 = vmatpush.msrb.mxu2 %v218_v21  ;;  %344 = vmatpush.msrb.mxu3 %v250_v22  ;;  %v244_v34 = vld [vmem:[%s1022_s3 + $0x178] sm:$0xff]  ;;  %v210_v37 = vld [vmem:[%s1022_s3 + $0x68] sm:$0xff]  ;;  %v207_v39 = vld [vmem:[%s1022_s3 + $0x50] sm:$0xff] }
  0x30   :  { %276 = vmatpush.msrb.mxu0 %v215_v23  ;;  %298 = vmatpush.msrb.mxu1 %v249_v24  ;;  %v242_v38 = vld [vmem:[%s1022_s3 + $0x168] sm:$0xff]  ;;  %v241_v40 = vld [vmem:[%s1022_s3 + $0x160] sm:$0xff]  ;;  %v208_v41 = vld [vmem:[%s1022_s3 + $0x58] sm:$0xff] }
  0x31   :  { %322 = vmatpush.msrb.mxu2 %v216_v25  ;;  %345 = vmatpush.msrb.mxu3 %v248_v26  ;;  %v240_v42 = vld [vmem:[%s1022_s3 + $0x158] sm:$0xff]  ;;  %v205_v43 = vld [vmem:[%s1022_s3 + $0x40] sm:$0xff]  ;;  %v239_v44 = vld [vmem:[%s1022_s3 + $0x150] sm:$0xff] }
  0x32   :  { %277 = vmatpush.msrb.mxu0 %v213_v27  ;;  %299 = vmatpush.msrb.mxu1 %v247_v28  ;;  %v206_v45 = vld [vmem:[%s1022_s3 + $0x48] sm:$0xff]  ;;  %v203_v46 = vld [vmem:[%s1022_s3 + $0x30] sm:$0xff]  ;;  %v237_v47 = vld [vmem:[%s1022_s3 + $0x140] sm:$0xff] }
  0x33   :  { %323 = vmatpush.msrb.mxu2 %v214_v29  ;;  %346 = vmatpush.msrb.mxu3 %v246_v30  ;;  %v204_v48 = vld [vmem:[%s1022_s3 + $0x38] sm:$0xff]  ;;  %v238_v49 = vld [vmem:[%s1022_s3 + $0x148] sm:$0xff]  ;;  %v201_v50 = vld [vmem:[%s1022_s3 + $0x20] sm:$0xff] }
  0x34   :  { %278 = vmatpush.msrb.mxu0 %v211_v31  ;;  %300 = vmatpush.msrb.mxu1 %v245_v32  ;;  %v235_v51 = vld [vmem:[%s1022_s3 + $0x130] sm:$0xff]  ;;  %v202_v52 = vld [vmem:[%s1022_s3 + $0x28] sm:$0xff]  ;;  %v236_v53 = vld [vmem:[%s1022_s3 + $0x138] sm:$0xff] }
  0x35   :  { %324 = vmatpush.msrb.mxu2 %v212_v33  ;;  %347 = vmatpush.msrb.mxu3 %v244_v34  ;;  %v199_v54 = vld [vmem:[%s1022_s3 + $0x10] sm:$0xff]  ;;  %v233_v55 = vld [vmem:[%s1022_s3 + $0x120] sm:$0xff]  ;;  %v200_v56 = vld [vmem:[%s1022_s3 + $0x18] sm:$0xff] }
  0x36   :  { %279 = vmatpush.msrb.mxu0 %v209_v35  ;;  %301 = vmatpush.msrb.mxu1 %v243_v36  ;;  %v234_v57 = vld [vmem:[%s1022_s3 + $0x128] sm:$0xff]  ;;  %v197_v58 = vld [vmem:[%s1022_s3] sm:$0xff]  ;;  %v231_v59 = vld [vmem:[%s1022_s3 + $0x110] sm:$0xff] }
  0x37   :  { %325 = vmatpush.msrb.mxu2 %v210_v37  ;;  %348 = vmatpush.msrb.mxu3 %v242_v38  ;;  %v198_v60 = vld [vmem:[%s1022_s3 + $0x8] sm:$0xff]  ;;  %v232_v61 = vld [vmem:[%s1022_s3 + $0x118] sm:$0xff]  ;;  %v229_v62 = vld [vmem:[%s1022_s3 + $0x100] sm:$0xff] }
  0x38   :  { %280 = vmatpush.msrb.mxu0 %v207_v39  ;;  %302 = vmatpush.msrb.mxu1 %v241_v40  ;;  %v230_v63 = vld [vmem:[%s1022_s3 + $0x108] sm:$0xff]  ;;  %v381_v0 = vld [vmem:[%s1024_s5 + $0x78] sm:$0xff]  ;;  %v380_v1 = vld [vmem:[%s1024_s5 + $0x70] sm:$0xff] }
  0x39   :  { %326 = vmatpush.msrb.mxu2 %v208_v41  ;;  %349 = vmatpush.msrb.mxu3 %v240_v42  ;;  %v379_v2 = vld [vmem:[%s1024_s5 + $0x68] sm:$0xff]  ;;  %v385_v3 = vld [vmem:[%s1024_s5 + $0x98] sm:$0xff]  ;;  %v378_v4 = vld [vmem:[%s1024_s5 + $0x60] sm:$0xff] }
  0x3a   :  { %281 = vmatpush.msrb.mxu0 %v205_v43  ;;  %303 = vmatpush.msrb.mxu1 %v239_v44  ;;  %v377_v5 = vld [vmem:[%s1024_s5 + $0x58] sm:$0xff]  ;;  %v95_v6 = vld [vmem:[%s1021_s2] sm:$0x3]  ;;  %v376_v7 = vld [vmem:[%s1024_s5 + $0x50] sm:$0xff] }
  0x3b   :  { %327 = vmatpush.msrb.mxu2 %v206_v45  ;;  %350 = vmatpush.msrb.mxu3 %v238_v49  ;;  %v97_v8 = vperm.slane %v95_v6, 0  ;;  %v375_v9 = vld [vmem:[%s1024_s5 + $0x48] sm:$0xff]  ;;  %v374_v10 = vld [vmem:[%s1024_s5 + $0x40] sm:$0xff]  ;;  %v98_v13 = vperm.slane %v95_v6, 1  ;;  %v373_v14 = vld [vmem:[%s1024_s5 + $0x38] sm:$0xff] }
  0x3c   :  { %282 = vmatpush.msrb.mxu0 %v203_v46  ;;  %304 = vmatpush.msrb.mxu1 %v237_v47  ;;  %v372_v17 = vld [vmem:[%s1024_s5 + $0x30] sm:$0xff]  ;;  %v371_v22 = vld [vmem:[%s1024_s5 + $0x28] sm:$0xff]  ;;  %v370_v24 = vld [vmem:[%s1024_s5 + $0x20] sm:$0xff] }
  0x3d   :  { %328 = vmatpush.msrb.mxu2 %v204_v48  ;;  %351 = vmatpush.msrb.mxu3 %v236_v53  ;;  %v369_v36 = vld [vmem:[%s1024_s5 + $0x18] sm:$0xff]  ;;  %v384_v37 = vld [vmem:[%s1024_s5 + $0x90] sm:$0xff]  ;;  %v367_v39 = vld [vmem:[%s1024_s5 + $0x8] sm:$0xff] }
  0x3e   :  { %283 = vmatpush.msrb.mxu0 %v201_v50  ;;  %305 = vmatpush.msrb.mxu1 %v235_v51  ;;  %v368_v38 = vld [vmem:[%s1024_s5 + $0x10] sm:$0xff]  ;;  %v383_v40 = vld [vmem:[%s1024_s5 + $0x88] sm:$0xff]  ;;  %v366_v41 = vld [vmem:[%s1024_s5] sm:$0xff] }
  0x3f   :  { %329 = vmatpush.msrb.mxu2 %v202_v52  ;;  %352 = vmatpush.msrb.mxu3 %v234_v57  ;;  %v382_v42 = vld [vmem:[%s1024_s5 + $0x80] sm:$0xff] }
  0x40   :  { %284 = vmatpush.msrb.mxu0 %v199_v54  ;;  %306 = vmatpush.msrb.mxu1 %v233_v55  ;;  %v257_v43 = vld [vmem:[%s1023_s4] sm:$0x3] }
  0x41   :  { %330 = vmatpush.msrb.mxu2 %v200_v56  ;;  %353 = vmatpush.msrb.mxu3 %v232_v61  ;;  %v259_v44 = vperm.slane %v257_v43, 0  ;;  %v260_v47 = vperm.slane %v257_v43, 1 }
  0x42   :  { %285 = vmatpush.msrb.mxu0 %v197_v58  ;;  %307 = vmatpush.msrb.mxu1 %v231_v59 }
  0x43   :  { %331 = vmatpush.msrb.mxu2 %v198_v60  ;;  %354 = vmatpush.msrb.mxu3 %v230_v63 }
  0x44   :  { %308 = vmatpush.msrb.mxu1 %v229_v62  ;;  %397 = vmatpush.msra.mxu0 %v381_v0 }
  0x45   :  { %432 = vmatpush.msra.mxu3 %v385_v3 }
  0x46   :  { %470 = vmatpush.msra.mxu1 %v381_v0  ;;  %398 = vmatpush.msra.mxu0 %v380_v1 }
  0x47   :  { %433 = vmatpush.msra.mxu3 %v384_v37 }
  0x48   :  { %471 = vmatpush.msra.mxu1 %v380_v1  ;;  %399 = vmatpush.msra.mxu0 %v379_v2 }
  0x49   :  { %434 = vmatpush.msra.mxu3 %v383_v40 }
  0x4a   :  { %472 = vmatpush.msra.mxu1 %v379_v2  ;;  %400 = vmatpush.msra.mxu0 %v378_v4  ;;  %v489_v2 = vld [vmem:[%s1025_s6] ss:$0 sm:$0xff]  ;;  %s517_s6 = smov 128  }
  0x4b   :  { %435 = vmatpush.msra.mxu3 %v382_v42 }
  0x4c   :  { %473 = vmatpush.msra.mxu1 %v378_v4  ;;  %401 = vmatpush.msra.mxu0 %v377_v5 }
  0x4e   :  { %474 = vmatpush.msra.mxu1 %v377_v5  ;;  %402 = vmatpush.msra.mxu0 %v376_v7 }
  0x50   :  { %475 = vmatpush.msra.mxu1 %v376_v7  ;;  %403 = vmatpush.msra.mxu0 %v375_v9 }
  0x52   :  { %476 = vmatpush.msra.mxu1 %v375_v9  ;;  %404 = vmatpush.msra.mxu0 %v374_v10 }
  0x54   :  { %477 = vmatpush.msra.mxu1 %v374_v10  ;;  %405 = vmatpush.msra.mxu0 %v373_v14 }
  0x56   :  { %478 = vmatpush.msra.mxu1 %v373_v14  ;;  %406 = vmatpush.msra.mxu0 %v372_v17 }
  0x58   :  { %479 = vmatpush.msra.mxu1 %v372_v17  ;;  %407 = vmatpush.msra.mxu0 %v371_v22 }
  0x5a   :  { %480 = vmatpush.msra.mxu1 %v371_v22  ;;  %408 = vmatpush.msra.mxu0 %v370_v24 }
  0x5c   :  { %481 = vmatpush.msra.mxu1 %v370_v24  ;;  %409 = vmatpush.msra.mxu0 %v369_v36 }
  0x5e   :  { %482 = vmatpush.msra.mxu1 %v369_v36  ;;  %410 = vmatpush.msra.mxu0 %v368_v38 }
  0x60   :  { %483 = vmatpush.msra.mxu1 %v368_v38  ;;  %411 = vmatpush.msra.mxu0 %v367_v39 }
  0x62   :  { %484 = vmatpush.msra.mxu1 %v367_v39  ;;  %412 = vmatpush.msra.mxu0 %v366_v41 }
  0x64   :  { %485 = vmatpush.msra.mxu1 %v366_v41 }
  0xa0   :  { %v118_v11 = vpop.f32.mrf.mxu0 }
  0xa1   :  { %v119_v12 = vadd.f32 %v118_v11, %v97_v8 }
  0xa2   :  { %v141_v15 = vpop.f32.mrf.mxu1 }
  0xa3   :  { %v142_v16 = vadd.f32 %v141_v15, %v119_v12 }
  0xa4   :  { %v164_v18 = vpop.f32.mrf.mxu2 }
  0xa5   :  { %v187_v19 = vpop.f32.mrf.mxu3  ;;  %v193_v20 = vmax.f32 %v142_v16, 0.0  ;;  %v165_v21 = vadd.f32 %v164_v18, %v98_v13 }
  0xa7   :  { %v188_v23 = vadd.f32 %v187_v19, %v165_v21  ;;  %286 = vmatmul.f32.vlgmr.msrb.gmra.mxu0 %v193_v20  ;;  %332 = vmatmul.f32.vlgmr.msrb.gmra.mxu2 %v193_v20 }
  0xa8   :  { %v121_v25 = vpop.f32.mrf.mxu0 }
  0xa9   :  { %v194_v26 = vmax.f32 %v188_v23, 0.0  ;;  %v122_v27 = vadd.f32 %v121_v25, %v97_v8 }
  0xaa   :  { %v144_v28 = vpop.f32.mrf.mxu1 }
  0xab   :  { %464 = vmatmul.msk.f32.vlgmr.msrb.gmra.mxu1 %vm263_vm0, %v194_v26  ;;  %466 = vmatmul.msk.f32.vlgmr.msrb.gmra.mxu3 %vm263_vm0, %v194_v26  ;;  %v145_v29 = vadd.f32 %v144_v28, %v122_v27 }
  0xac   :  { %v167_v30 = vpop.f32.mrf.mxu2 }
  0xad   :  { %v190_v31 = vpop.f32.mrf.mxu3  ;;  %v195_v32 = vmax.f32 %v145_v29, 0.0  ;;  %v168_v33 = vadd.f32 %v167_v30, %v98_v13 }
  0xaf   :  { %v191_v34 = vadd.f32 %v190_v31, %v168_v33  ;;  %289 = vmatmul.f32.gmra.mxu0 %v195_v32  ;;  %335 = vmatmul.f32.gmra.mxu2 %v195_v32 }
  0xb1   :  { %v196_v35 = vmax.f32 %v191_v34, 0.0 }
  0xb3   :  { %465 = vmatmul.msk.f32.gmra.mxu1 %vm263_vm0, %v196_v35  ;;  %467 = vmatmul.msk.f32.gmra.mxu3 %vm263_vm0, %v196_v35 }
 0x124   :  { %v287_v45 = vpop.f32.mrf.mxu0 }
 0x125   :  { %v288_v46 = vadd.f32 %v287_v45, %v259_v44 }
 0x128   :  { %v310_v48 = vpop.f32.mrf.mxu1 }
 0x129   :  { %v311_v49 = vadd.f32 %v310_v48, %v288_v46 }
 0x12a   :  { %v333_v50 = vpop.f32.mrf.mxu2 }
 0x12b   :  { %v362_v51 = vmax.f32 %v311_v49, 0.0  ;;  %v334_v52 = vadd.f32 %v333_v50, %v260_v47 }
 0x12c   :  { %v290_v53 = vpop.f32.mrf.mxu0 }
 0x12d   :  { %413 = vmatmul.f32.vlgmr.msra.gmra.mxu0 %v362_v51  ;;  %v291_v54 = vadd.f32 %v290_v53, %v259_v44 }
 0x12e   :  { %v356_v55 = vpop.f32.mrf.mxu3 }
 0x12f   :  { %v357_v56 = vadd.f32 %v356_v55, %v334_v52 }
 0x130   :  { %v313_v57 = vpop.f32.mrf.mxu1 }
 0x131   :  { %v363_v58 = vmax.f32 %v357_v56, 0.0  ;;  %v314_v59 = vadd.f32 %v313_v57, %v291_v54 }
 0x132   :  { %v336_v60 = vpop.f32.mrf.mxu2 }
 0x133   :  { %v364_v61 = vmax.f32 %v314_v59, 0.0  ;;  %468 = vmatmul.msk.f32.vlgmr.msra.gmra.mxu3 %vm390_vm1, %v363_v58  ;;  %v337_v62 = vadd.f32 %v336_v60, %v260_v47 }
 0x135   :  { %416 = vmatmul.f32.vlgmr.msra.gmra.mxu1 %v364_v61 }
 0x136   :  { %v359_v63 = vpop.f32.mrf.mxu3 }
 0x137   :  { %v360_v0 = vadd.f32 %v359_v63, %v337_v62 }
 0x139   :  { %v365_v1 = vmax.f32 %v360_v0, 0.0 }
 0x13b   :  { %469 = vmatmul.msk.f32.gmra.mxu3 %vm390_vm1, %v365_v1 }
 0x1aa   :  { %v414_v3 = vpop.f32.mrf.mxu0 }
 0x1ab   :  { %v415_v4 = vadd.f32 %v489_v2, %v414_v3 }
 0x1b2   :  { %v417_v7 = vpop.f32.mrf.mxu1 }
 0x1b3   :  { %v418_v8 = vadd.f32 %v489_v2, %v417_v7 }
 0x1b6   :  { %v437_v5 = vpop.f32.mrf.mxu3 }
 0x1b7   :  { %v438_v6 = vadd.f32 %v437_v5, %v415_v4 }
 0x1b9   :  { %444 = vst.msk [vmem:[#allocation2] sm:$0xff] %vm443_vm2, %v438_v6 }
 0x1be   :  { %v440_v9 = vpop.f32.mrf.mxu3 }
 0x1bf   :  { %v441_v10 = vadd.f32 %v440_v9, %v418_v8 }
 0x1c1   :  { %445 = vst.msk [vmem:[#allocation2 + $0x8] sm:$0xff] %vm443_vm2, %v441_v10 }
 0x1c2   :  { %458 = dma.vmem_to_hbm [thread:$0]  %s451_s10, 256, %s453_s12, [#allocation3], %s517_s6, %s517_s6, %s518_s13  }
 0x1c3   :  { %514 = dma.done.wait [#allocation3], 256  }
 0x1c4   :  { %515 = vsyncadd [#allocation3], 4294967040 }
 0x1c5   :  { %463 = vsyncpa [#allocation3], 1 }

</bundles_post_ra>
